<compile_context>
chip_gen: v7x
topology: tpu7x:2x2x1
jax: 0.10.0
libtpu: 0.0.40
codegen_flags: <defaults>
</compile_context>

<pallas_src>
import jax
import jax.numpy as jnp
from jax.experimental import pallas as pl
from jax.experimental.pallas import tpu as pltpu

# Small, module-consistent stand-in shapes (2048 -> 4 in-channels, 256 -> 32 mid-channels).
N, C_IN, H, W = 2, 4, 16, 16
C_MID = 32
HW = H * W
OUT_LANES = 128  # lane-dense padded output; wrapper slices [:, :3]


def _pack_params(params):
    """Pack every weight/bias into one f32 buffer; bias is the last column of each block."""
    w1, b1 = params["w1"], params["b1"]
    w2, b2 = params["w2"], params["b2"]
    w3, b3 = params["w3"], params["b3"]
    w_hm = params["w_hm"]
    w_d, b_d = params["w_d"], params["b_d"]
    cm, ci = w1.shape
    width = cm + 1
    blk = ((cm + 1 + 7) // 8) * 8                 # 8-sublane aligned block stride
    r1, r2, r3, r4 = 0, blk, blk + cm, blk + 2 * cm
    wp = jnp.zeros((r4 + 1, width), jnp.float32)
    wp = wp.at[r1:r1 + cm, :ci].set(w1)           # layer-1 weights
    wp = wp.at[r1 + cm, :ci].set(w_d[0])          # depth conv fused as extra output row
    wp = wp.at[r1:r1 + cm, ci].set(b1)            # layer-1 bias column
    wp = wp.at[r1 + cm, ci].set(b_d)              # depth bias (per-pixel == post-GAP; conv is affine)
    wp = wp.at[r2:r2 + cm, :cm].set(w2)
    wp = wp.at[r2:r2 + cm, cm].set(b2)
    wp = wp.at[r3:r3 + cm, :cm].set(w3)
    wp = wp.at[r3:r3 + cm, cm].set(b3)
    wp = wp.at[r4, :cm].set(w_hm[0])              # heatmap conv; its bias is a softmax no-op -> dropped
    return wp, (r1, r2, r3, r4, cm, ci)


def root_net_pallas(x_nchw, params, k_value):
    n, c_in, h, w = x_nchw.shape
    hw = h * w
    wpack, (r1, r2, r3, r4, cm, ci) = _pack_params(params)
    assert ci == c_in

    # Batch folded into lanes: (N,C,H,W) -> (C, N*HW); every 1x1 conv becomes a 2-D matmul.
    x2d = x_nchw.reshape(n, c_in, hw).transpose(1, 0, 2).reshape(c_in, n * hw)
    kcol = jnp.asarray(k_value, jnp.float32).reshape(n, 1)

    pow2 = (w & (w - 1)) == 0
    shift = w.bit_length() - 1

    def kernel(x_ref, wp_ref, k_ref, out_ref):
        x = x_ref[...]                      # (C_in, N*HW)
        wp = wp_ref[...]                    # packed weights; static value slices below are cheap

        # deconv-stack stand-in: 3x (1x1 conv [BN folded] + ReLU) on the MXU.
        # Layer 1 also carries the depth conv as output row `cm`.
        y1 = jnp.dot(wp[r1:r1 + cm + 1, 0:ci], x,
                     preferred_element_type=jnp.float32) + wp[r1:r1 + cm + 1, ci:ci + 1]
        hid = jnp.maximum(y1[0:cm], 0.0)
        z = y1[cm:cm + 1]                   # (1, N*HW): w_d . x + b_d per pixel

        y2 = jnp.dot(wp[r2:r2 + cm, 0:cm], hid,
                     preferred_element_type=jnp.float32) + wp[r2:r2 + cm, cm:cm + 1]
        hid = jnp.maximum(y2, 0.0)
        y3 = jnp.dot(wp[r3:r3 + cm, 0:cm], hid,
                     preferred_element_type=jnp.float32) + wp[r3:r3 + cm, cm:cm + 1]
        fm = jnp.maximum(y3, 0.0)           # (C_mid, N*HW)

        # xy branch: heatmap logits (bias dropped — softmax is shift-invariant).
        logits = jnp.dot(wp[r4:r4 + 1, 0:cm], fm,
                         preferred_element_type=jnp.float32)       # (1, N*HW)

        # Split flat lane axis back to per-sample rows (hw = 256 is a multiple of 128 here,
        # so these are clean lane-tile slices + a tiny sublane concat).
        lg = jnp.concatenate([logits[:, i * hw:(i + 1) * hw] for i in range(n)], axis=0)
        zm = jnp.concatenate([z[:, i * hw:(i + 1) * hw] for i in range(n)], axis=0)

        m = jnp.max(lg, axis=-1, keepdims=True)   # per-sample max for stable softmax
        e = jnp.exp(lg - m)                       # (N, HW) softmax numerator

        # One MXU matmul computes softmax denom, sum(e*xs), sum(e*ys) and the depth GAP:
        # constant (HW, 128) matrix with lane0=xs, lane1=ys, lane2=1, rest 0 (built in-kernel,
        # no extra HBM input).
        h_idx = jax.lax.broadcasted_iota(jnp.int32, (hw, OUT_LANES), 0)
        l_idx = jax.lax.broadcasted_iota(jnp.int32, (hw, OUT_LANES), 1)
        if pow2:
            xs = (h_idx & (w - 1)).astype(jnp.float32)
            ys = (h_idx >> shift).astype(jnp.float32)
        else:
            xs = (h_idx % w).astype(jnp.float32)
            ys = (h_idx // w).astype(jnp.float32)
        cmat = jnp.where(l_idx == 0, xs,
               jnp.where(l_idx == 1, ys,
               jnp.where(l_idx == 2, 1.0, 0.0)))

        red = jnp.dot(jnp.concatenate([e, zm], axis=0), cmat,
                      preferred_element_type=jnp.float32)          # (2N, 128)
        er, zr = red[0:n], red[n:2 * n]
        inv = pl.reciprocal(er[:, 2:3], approx=False)              # exact softmax normalization
        coords = er * inv                   # lane0=coord_x, lane1=coord_y, lane2=1, lanes>=3 = 0
        gamma = zr[:, 2:3] * (1.0 / hw)     # GAP(w_d . x) + b_d per sample
        depth = gamma * k_ref[...]          # (N, 1)

        lane = jax.lax.broadcasted_iota(jnp.int32, out_ref.shape, 1)
        out_ref[...] = jnp.where(lane == 2, depth, coords)         # single lane-dense store

    vmem = pl.BlockSpec(memory_space=pltpu.MemorySpace.VMEM)
    out = pl.pallas_call(
        kernel,
        out_shape=jax.ShapeDtypeStruct((n, OUT_LANES), jnp.float32),
        in_specs=[vmem, vmem, vmem],
        out_specs=vmem,
    )(x2d, wpack, kcol)
    return out[:, :3]


def root_net_ref(x_nchw, params, k_value):
    """Pure-JAX reference of the same (simplified) forward pass."""
    n, c, h, w = x_nchw.shape
    hw = h * w
    xf = x_nchw.reshape(n, c, hw).astype(jnp.float32)
    hp = jax.lax.Precision.HIGHEST

    def conv1x1_relu(wt, b, inp):
        return jnp.maximum(
            jnp.einsum("oc,nch->noh", wt, inp, precision=hp) + b[None, :, None], 0.0)

    fm = conv1x1_relu(params["w1"], params["b1"], xf)
    fm = conv1x1_relu(params["w2"], params["b2"], fm)
    fm = conv1x1_relu(params["w3"], params["b3"], fm)

    logits = jnp.einsum("c,nch->nh", params["w_hm"][0], fm, precision=hp) + params["b_hm"]
    p = jax.nn.softmax(logits, axis=-1)
    xs = (jnp.arange(hw) % w).astype(jnp.float32)
    ys = (jnp.arange(hw) // w).astype(jnp.float32)
    cx = jnp.sum(p * xs, axis=-1, keepdims=True)
    cy = jnp.sum(p * ys, axis=-1, keepdims=True)

    pooled = jnp.mean(xf, axis=-1)                        # GAP over spatial of the input x
    gamma = pooled @ params["w_d"][0] + params["b_d"]
    depth = gamma[:, None] * jnp.asarray(k_value, jnp.float32).reshape(-1, 1)
    return jnp.concatenate([cx, cy, depth], axis=-1)


if __name__ == "__main__":
    key = jax.random.PRNGKey(0)
    kx, kw1, kb1, kw2, kb2, kw3, kb3, khm, kd, kk = jax.random.split(key, 10)

    x = jax.random.normal(kx, (N, C_IN, H, W), dtype=jnp.float32)
    params = {
        "w1": 0.30 * jax.random.normal(kw1, (C_MID, C_IN), dtype=jnp.float32),
        "b1": 0.05 * jax.random.normal(kb1, (C_MID,), dtype=jnp.float32),
        "w2": 0.15 * jax.random.normal(kw2, (C_MID, C_MID), dtype=jnp.float32),
        "b2": 0.05 * jax.random.normal(kb2, (C_MID,), dtype=jnp.float32),
        "w3": 0.15 * jax.random.normal(kw3, (C_MID, C_MID), dtype=jnp.float32),
        "b3": 0.05 * jax.random.normal(kb3, (C_MID,), dtype=jnp.float32),
        "w_hm": 0.20 * jax.random.normal(khm, (1, C_MID), dtype=jnp.float32),
        "b_hm": jnp.float32(0.1),    # xy_layer bias (softmax no-op; kernel drops it, ref keeps it)
        "w_d": 0.20 * jax.random.normal(kd, (1, C_IN), dtype=jnp.float32),
        "b_d": jnp.float32(-0.2),    # depth_layer bias (folded into the packed layer-1 block)
    }
    k_value = 1.0 + jax.random.uniform(kk, (N,), dtype=jnp.float32)

    coord = jax.jit(root_net_pallas)(x, params, k_value)
    coord = jax.block_until_ready(coord)

    ref = root_net_ref(x, params, k_value)
    assert coord.shape == (N, 3), coord.shape
    # Tolerance covers MXU f32 multi-pass matmul vs XLA-HIGHEST einsum reference differences.
    assert jnp.allclose(coord, ref, atol=2e-3, rtol=2e-3), (coord, ref)
    print("KERNEL_OK")
</pallas_src>

<mosaic_0001>
module attributes {stable_mosaic.version = 11 : i64} {
  func.func @kernel(%arg0: memref<4x512xf32, #tpu.memory_space<vmem>>, %arg1: memref<105x33xf32, #tpu.memory_space<vmem>>, %arg2: memref<2x1xf32, #tpu.memory_space<vmem>>, %arg3: memref<2x128xf32, #tpu.memory_space<vmem>>) attributes {dimension_semantics = [], scalar_prefetch = 0 : i64, scratch_operands = 0 : i64, tpu.core_type = #tpu.core_type<tc>} {
    %c0 = arith.constant 0 : index
    %c0_0 = arith.constant 0 : index
    %0 = vector.load %arg0[%c0, %c0_0] : memref<4x512xf32, #tpu.memory_space<vmem>>, vector<4x512xf32>
    %c0_1 = arith.constant 0 : index
    %c0_2 = arith.constant 0 : index
    %1 = vector.load %arg1[%c0_1, %c0_2] : memref<105x33xf32, #tpu.memory_space<vmem>>, vector<105x33xf32>
    %2 = vector.extract_strided_slice %1 {offsets = [0, 0], sizes = [33, 4], strides = [1, 1]} : vector<105x33xf32> to vector<33x4xf32>
    %cst = arith.constant dense<0.000000e+00> : vector<33x512xf32>
    %3 = tpu.matmul %2, %0, %cst {dimension_numbers = #tpu.dot_dimension_numbers<[1], [0], [0], [1], [0, 0, 1, 1], [], []>} : vector<33x4xf32>, vector<4x512xf32>, vector<33x512xf32> -> vector<33x512xf32>
    %4 = vector.extract_strided_slice %1 {offsets = [0, 4], sizes = [33, 1], strides = [1, 1]} : vector<105x33xf32> to vector<33x1xf32>
    %5 = vector.broadcast %4 : vector<33x1xf32> to vector<33x512xf32>
    %6 = arith.addf %3, %5 : vector<33x512xf32>
    %7 = vector.extract_strided_slice %6 {offsets = [0, 0], sizes = [32, 512], strides = [1, 1]} : vector<33x512xf32> to vector<32x512xf32>
    %cst_3 = arith.constant 0.000000e+00 : f32
    %8 = vector.broadcast %cst_3 : f32 to vector<32x512xf32>
    %9 = arith.maximumf %7, %8 : vector<32x512xf32>
    %10 = vector.extract_strided_slice %6 {offsets = [32, 0], sizes = [1, 512], strides = [1, 1]} : vector<33x512xf32> to vector<1x512xf32>
    %11 = vector.extract_strided_slice %1 {offsets = [40, 0], sizes = [32, 32], strides = [1, 1]} : vector<105x33xf32> to vector<32x32xf32>
    %cst_4 = arith.constant dense<0.000000e+00> : vector<32x512xf32>
    %12 = tpu.matmul %11, %9, %cst_4 {dimension_numbers = #tpu.dot_dimension_numbers<[1], [0], [0], [1], [0, 0, 1, 1], [], []>} : vector<32x32xf32>, vector<32x512xf32>, vector<32x512xf32> -> vector<32x512xf32>
    %13 = vector.extract_strided_slice %1 {offsets = [40, 32], sizes = [32, 1], strides = [1, 1]} : vector<105x33xf32> to vector<32x1xf32>
    %14 = vector.broadcast %13 : vector<32x1xf32> to vector<32x512xf32>
    %15 = arith.addf %12, %14 : vector<32x512xf32>
    %cst_5 = arith.constant 0.000000e+00 : f32
    %16 = vector.broadcast %cst_5 : f32 to vector<32x512xf32>
    %17 = arith.maximumf %15, %16 : vector<32x512xf32>
    %18 = vector.extract_strided_slice %1 {offsets = [72, 0], sizes = [32, 32], strides = [1, 1]} : vector<105x33xf32> to vector<32x32xf32>
    %cst_6 = arith.constant dense<0.000000e+00> : vector<32x512xf32>
    %19 = tpu.matmul %18, %17, %cst_6 {dimension_numbers = #tpu.dot_dimension_numbers<[1], [0], [0], [1], [0, 0, 1, 1], [], []>} : vector<32x32xf32>, vector<32x512xf32>, vector<32x512xf32> -> vector<32x512xf32>
    %20 = vector.extract_strided_slice %1 {offsets = [72, 32], sizes = [32, 1], strides = [1, 1]} : vector<105x33xf32> to vector<32x1xf32>
    %21 = vector.broadcast %20 : vector<32x1xf32> to vector<32x512xf32>
    %22 = arith.addf %19, %21 : vector<32x512xf32>
    %cst_7 = arith.constant 0.000000e+00 : f32
    %23 = vector.broadcast %cst_7 : f32 to vector<32x512xf32>
    %24 = arith.maximumf %22, %23 : vector<32x512xf32>
    %25 = vector.extract_strided_slice %1 {offsets = [104, 0], sizes = [1, 32], strides = [1, 1]} : vector<105x33xf32> to vector<1x32xf32>
    %cst_8 = arith.constant dense<0.000000e+00> : vector<1x512xf32>
    %26 = tpu.matmul %25, %24, %cst_8 {dimension_numbers = #tpu.dot_dimension_numbers<[1], [0], [0], [1], [0, 0, 1, 1], [], []>} : vector<1x32xf32>, vector<32x512xf32>, vector<1x512xf32> -> vector<1x512xf32>
    %27 = vector.extract_strided_slice %26 {offsets = [0, 0], sizes = [1, 256], strides = [1, 1]} : vector<1x512xf32> to vector<1x256xf32>
    %28 = vector.extract_strided_slice %26 {offsets = [0, 256], sizes = [1, 256], strides = [1, 1]} : vector<1x512xf32> to vector<1x256xf32>
    %29 = tpu.concatenate %27, %28 in 0 : vector<1x256xf32>, vector<1x256xf32> -> vector<2x256xf32>
    %30 = vector.extract_strided_slice %10 {offsets = [0, 0], sizes = [1, 256], strides = [1, 1]} : vector<1x512xf32> to vector<1x256xf32>
    %31 = vector.extract_strided_slice %10 {offsets = [0, 256], sizes = [1, 256], strides = [1, 1]} : vector<1x512xf32> to vector<1x256xf32>
    %32 = tpu.concatenate %30, %31 in 0 : vector<1x256xf32>, vector<1x256xf32> -> vector<2x256xf32>
    %cst_9 = arith.constant dense<0xFF800000> : vector<2xf32>
    %33 = vector.multi_reduction <maximumf>, %29, %cst_9 [1] : vector<2x256xf32> to vector<2xf32>
    %34 = vector.shape_cast %33 : vector<2xf32> to vector<2x1xf32>
    %35 = vector.broadcast %34 : vector<2x1xf32> to vector<2x256xf32>
    %36 = arith.subf %29, %35 : vector<2x256xf32>
    %37 = math.exp %36 : vector<2x256xf32>
    %38 = tpu.iota {dimensions = array<i32: 0>} : vector<256x128xi32>
    %39 = tpu.iota {dimensions = array<i32: 1>} : vector<256x128xi32>
    %c15_i32 = arith.constant 15 : i32
    %40 = vector.broadcast %c15_i32 : i32 to vector<256x128xi32>
    %41 = arith.andi %38, %40 : vector<256x128xi32>
    %42 = arith.sitofp %41 : vector<256x128xi32> to vector<256x128xf32>
    %c4_i32 = arith.constant 4 : i32
    %43 = vector.broadcast %c4_i32 : i32 to vector<256x128xi32>
    %44 = arith.shrsi %38, %43 : vector<256x128xi32>
    %45 = arith.sitofp %44 : vector<256x128xi32> to vector<256x128xf32>
    %c0_i32 = arith.constant 0 : i32
    %46 = vector.broadcast %c0_i32 : i32 to vector<256x128xi32>
    %47 = arith.cmpi eq, %39, %46 : vector<256x128xi32>
    %c1_i32 = arith.constant 1 : i32
    %48 = vector.broadcast %c1_i32 : i32 to vector<256x128xi32>
    %49 = arith.cmpi eq, %39, %48 : vector<256x128xi32>
    %c2_i32 = arith.constant 2 : i32
    %50 = vector.broadcast %c2_i32 : i32 to vector<256x128xi32>
    %51 = arith.cmpi eq, %39, %50 : vector<256x128xi32>
    %cst_10 = arith.constant 1.000000e+00 : f32
    %cst_11 = arith.constant 0.000000e+00 : f32
    %52 = vector.broadcast %cst_10 : f32 to vector<256x128xf32>
    %53 = vector.broadcast %cst_11 : f32 to vector<256x128xf32>
    %54 = arith.select %51, %52, %53 : vector<256x128xi1>, vector<256x128xf32>
    %55 = arith.select %49, %45, %54 : vector<256x128xi1>, vector<256x128xf32>
    %56 = arith.select %47, %42, %55 : vector<256x128xi1>, vector<256x128xf32>
    %57 = tpu.concatenate %37, %32 in 0 : vector<2x256xf32>, vector<2x256xf32> -> vector<4x256xf32>
    %cst_12 = arith.constant dense<0.000000e+00> : vector<4x128xf32>
    %58 = tpu.matmul %57, %56, %cst_12 {dimension_numbers = #tpu.dot_dimension_numbers<[1], [0], [0], [1], [0, 0, 1, 1], [], []>} : vector<4x256xf32>, vector<256x128xf32>, vector<4x128xf32> -> vector<4x128xf32>
    %59 = vector.extract_strided_slice %58 {offsets = [0, 0], sizes = [2, 128], strides = [1, 1]} : vector<4x128xf32> to vector<2x128xf32>
    %60 = vector.extract_strided_slice %58 {offsets = [2, 0], sizes = [2, 128], strides = [1, 1]} : vector<4x128xf32> to vector<2x128xf32>
    %61 = vector.extract_strided_slice %59 {offsets = [0, 2], sizes = [2, 1], strides = [1, 1]} : vector<2x128xf32> to vector<2x1xf32>
    %62 = tpu.reciprocal %61 : vector<2x1xf32> -> vector<2x1xf32>
    %63 = vector.broadcast %62 : vector<2x1xf32> to vector<2x128xf32>
    %64 = arith.mulf %59, %63 : vector<2x128xf32>
    %65 = vector.extract_strided_slice %60 {offsets = [0, 2], sizes = [2, 1], strides = [1, 1]} : vector<2x128xf32> to vector<2x1xf32>
    %cst_13 = arith.constant 3.906250e-03 : f32
    %66 = vector.broadcast %cst_13 : f32 to vector<2x1xf32>
    %67 = arith.mulf %65, %66 : vector<2x1xf32>
    %c0_14 = arith.constant 0 : index
    %c0_15 = arith.constant 0 : index
    %68 = vector.load %arg2[%c0_14, %c0_15] : memref<2x1xf32, #tpu.memory_space<vmem>>, vector<2x1xf32>
    %69 = arith.mulf %67, %68 : vector<2x1xf32>
    %70 = tpu.iota {dimensions = array<i32: 1>} : vector<2x128xi32>
    %c2_i32_16 = arith.constant 2 : i32
    %71 = vector.broadcast %c2_i32_16 : i32 to vector<2x128xi32>
    %72 = arith.cmpi eq, %70, %71 : vector<2x128xi32>
    %73 = vector.shape_cast %69 : vector<2x1xf32> to vector<2x1xf32>
    %74 = vector.broadcast %73 : vector<2x1xf32> to vector<2x128xf32>
    %75 = arith.select %72, %74, %64 : vector<2x128xi1>, vector<2x128xf32>
    %c0_17 = arith.constant 0 : index
    %c0_18 = arith.constant 0 : index
    %76 = vector.load %arg3[%c0_17, %c0_18] : memref<2x128xf32, #tpu.memory_space<vmem>>, vector<2x128xf32>
    tpu.vector_store %arg3[%c0_17, %c0_18], %75 {strides = array<i32>} : memref<2x128xf32, #tpu.memory_space<vmem>>, vector<2x128xf32>,
    return
  }
}

</mosaic_0001>

<bundles_post_ra>
// kernel: root_net_pallas.1
= control target key start
LH: loop header
LB: loop body
LE: loop exit
PB: predicated region body
PF: predicated region fallthrough
CT: control target
= control target key end

     0   :  { %vm71_vm0 = vcmask 1043456   ;;  %v1444_v4 = vmov 0.0   ;;  %vm60_vm1 = vcmask 31744   ;;  %v1445_v6 = vmov 4   ;;  %s1880_s0 = inlined_call_operand.vmem [shape: f32[4,512], index: 0, kind: input, shape index: {}]   ;;  %s1881_s1 = inlined_call_operand.vmem [shape: f32[105,33], index: 1, kind: input, shape index: {}]   ;;  %s1882_s2 = inlined_call_operand.vmem [shape: f32[2,1], index: 2, kind: input, shape index: {}]   ;;  %s1883_s3 = inlined_call_operand.hbm [shape: f32[2,128], index: 3, kind: output, shape index: {}]  }
   0x1   :  { %v15_v0 = vld [vmem:[%s1880_s0] sm:$0xff]  ;;  %v16_v1 = vld [vmem:[%s1880_s0 + $0x8] sm:$0xff]  ;;  %144 = vmatprep.mubr.f32.mxu0 %v1444_v4  ;;  %239 = vmatprep.mubr.f32.mxu1 %v1444_v4 }
   0x2   :  { %v58_v2 = vcombine.high %v15_v0, %v15_v0  ;;  %v59_v3 = vcombine.high %v16_v1, %v16_v1  ;;  %v17_v5 = vld [vmem:[%s1881_s1] sm:$0xff]  ;;  %1406 = vset.pattern.permute.xlu0 %v1445_v6  ;;  %1407 = vset.pattern.permute.xlu1 %v1445_v6 }
   0x3   :  { %8 = vsyncpa [#allocation3], 0  ;;  %v18_v7 = vld [vmem:[%s1881_s1 + $0x8] sm:$0xff]  ;;  %v19_v8 = vld [vmem:[%s1881_s1 + $0x10] sm:$0xff]  ;;  %33 = vperm.xlu0 %1406, %v17_v5   ;;  %v1446_v13 = vmov 32   ;;  %vm306_vm2 = vcmask 261120  }
   0x4   :  { %1253 = vmatprep.subr.msk.mxu0 %vm71_vm0, %v58_v2  ;;  %1260 = vmatprep.subr.msk.mxu1 %vm71_vm0, %v59_v3  ;;  %v20_v9 = vld [vmem:[%s1881_s1 + $0x18] sm:$0xff]  ;;  %v21_v10 = vld [vmem:[%s1881_s1 + $0x20] sm:$0xff]  ;;  %v1520_v11 = vld [vmem:[%s1881_s1 + $0x28] sm:$0xff]  ;;  %vm882_vm3 = vcmask 1040384   ;;  %vm893_vm7 = vcmask 1041408   ;;  %s1449_s17 = smov [#allocation2]  }
   0x5   :  { %1254 = vmatpush1.msk.msra.mxu0 %vm71_vm0, %v15_v0  ;;  %1261 = vmatpush1.msk.msra.mxu1 %vm71_vm0, %v16_v1  ;;  %v1525_v12 = vld [vmem:[%s1881_s1 + $0x30] sm:$0xff]  ;;  %v1532_v14 = vld [vmem:[%s1881_s1 + $0x38] sm:$0xff]  ;;  %v1537_v15 = vld [vmem:[%s1881_s1 + $0x40] sm:$0xff]  ;;  %s1245_s0 = sshll.u32 %s1449_s17, 4  ;;  %s1246_s0 = int_to_ptr.vmem [resolvable:$true] %s1245_s0 }
   0x6   :  { %1255 = vmatmul.mubr.msk.f32.vlgmr.msra.gmra.mrb[0].mxu0 %vm60_vm1, %v17_v5  ;;  %1262 = vmatmul.mubr.msk.f32.vlgmr.msra.gmra.mrb[0].mxu1 %vm60_vm1, %v17_v5  ;;  %v1544_v16 = vld [vmem:[%s1881_s1 + $0x50] sm:$0xff]  ;;  %v1549_v17 = vld [vmem:[%s1881_s1 + $0x48] sm:$0xff]  ;;  %v1556_v18 = vld [vmem:[%s1881_s1 + $0x60] sm:$0xff]  ;;  %s1420_s18 = scalar_lea.vmem %s1246_s0, 32  ;;  %p1425_p1 = scmp.lt.s32.totalorder %s1246_s0, %s1246_s0 }
   0x7   :  { %150 = vmatprep.mubr.f32.mxu0 %v1444_v4  ;;  %245 = vmatprep.mubr.f32.mxu1 %v1444_v4  ;;  %v1561_v19 = vld [vmem:[%s1881_s1 + $0x58] sm:$0xff]  ;;  %p1421_p0 = scmp.ne.s32.totalorder %s1246_s0, %s1420_s18  ;;  %p1426_p2 = scmp.lt.s32.totalorder %s1420_s18, %s1420_s18 }
   0x8   :  { %43 = vperm.xlu1 %1407, %v19_v8   ;;  %38 = vperm.xlu0 %1406, %v18_v7  }
   0x9   :  { %p1427_p3 = por %p1426_p2, %p1425_p1 }
   0xa   :  { %1256 = vmatmul.mubr.msk.f32.gmra.mrb[2].mxu0 %vm60_vm1, %v18_v7  ;;  %1263 = vmatmul.mubr.msk.f32.gmra.mrb[2].mxu1 %vm60_vm1, %v18_v7 }
   0xb   :  { %156 = vmatprep.mubr.f32.mxu0 %v1444_v4  ;;  %251 = vmatprep.mubr.f32.mxu1 %v1444_v4  ;;  %p1428_p4 = pnand %p1427_p3, %p1421_p0 }
   0xc   :  { %48 = vperm.xlu1 %1407, %v20_v9   ;;  %1408 = vset.pattern.permute.xlu0 %v1446_v13 }
   0xd   :  { %288 = vperm.xlu0 %1408, %v1520_v11  }
   0xe   :  { %1257 = vmatmul.mubr.msk.f32.gmra.mrb[4].mxu0 %vm60_vm1, %v19_v8  ;;  %1264 = vmatmul.mubr.msk.f32.gmra.mrb[4].mxu1 %vm60_vm1, %v19_v8 }
   0xf   :  { %162 = vmatprep.mubr.f32.mxu0 %v1444_v4  ;;  %257 = vmatprep.mubr.f32.mxu1 %v1444_v4 }
  0x10   :  { %1409 = vset.pattern.permute.xlu1 %v1446_v13 }
  0x11   :  { %293 = vperm.xlu1 %1409, %v1525_v12   ;;  %303 = vperm.xlu0 %1408, %v1537_v15  }
  0x12   :  { %1258 = vmatmul.mubr.msk.f32.gmra.mrb[6].mxu0 %vm60_vm1, %v20_v9  ;;  %1265 = vmatmul.mubr.msk.f32.gmra.mrb[6].mxu1 %vm60_vm1, %v20_v9 }
  0x13   :  { %263 = vmatprep.mubr.f32.mxu1 %v1444_v4  ;;  %168 = vmatprep.mubr.f32.mxu0 %v1444_v4 }
  0x15   :  { %298 = vperm.xlu1 %1409, %v1532_v14   ;;  %516 = vperm.xlu0 %1408, %v1544_v16  }
  0x16   :  { %1266 = vmatmul.mubr.msk.f32.gmra.mrb[8].mxu1 %vm60_vm1, %v21_v10  ;;  %1259 = vmatmul.mubr.msk.f32.gmra.mrb[8].mxu0 %vm60_vm1, %v21_v10 }
  0x17   :  { %379 = vmatprep.mubr.f32.mxu1 %v1444_v4  ;;  %601 = vmatprep.mubr.f32.mxu0 %v1444_v4 }
  0x19   :  { %511 = vperm.xlu1 %1409, %v1549_v17   ;;  %526 = vperm.xlu0 %1408, %v1556_v18  }
  0x1d   :  { %521 = vperm.xlu1 %1409, %v1561_v19   ;;  %1410 = vset.pattern.permute.xlu0 %v1445_v6 }
  0x1e   :  { %53 = vperm.xlu0 %1410, %v21_v10  }
  0x82   :  { %v34_v20 = vpop.permute.xlu0 %33 }
  0x87   :  { %v39_v26 = vpop.permute.xlu0 %38  ;;  %v44_v29 = vpop.permute.xlu1 %43 }
  0x8b   :  { %v49_v57 = vpop.permute.xlu1 %48 }
  0xd9   :  { %v146_v21 = vpop.f32.mrb[0].mxu0  ;;  %v241_v22 = vpop.f32.mrb[0].mxu1 }
  0xda   :  { %v242_v23 = vadd.f32 %v241_v22, %v34_v20  ;;  %v148_v24 = vpop.f32.mrb[1].mxu0  ;;  %v243_v25 = vpop.f32.mrb[1].mxu1  ;;  %v147_v28 = vadd.f32 %v146_v21, %v34_v20 }
  0xdb   :  { %v244_v27 = vadd.f32 %v243_v25, %v34_v20  ;;  %v149_v30 = vadd.f32 %v148_v24, %v34_v20  ;;  %v289_v25 = vpop.permute.xlu0 %288 }
  0xdc   :  { %v272_v33 = vmax.f32 %v242_v23, 0.0  ;;  %v270_v41 = vmax.f32 %v147_v28, 0.0 }
  0xdd   :  { %v152_v31 = vpop.f32.mrb[2].mxu0  ;;  %v247_v32 = vpop.f32.mrb[2].mxu1  ;;  %v273_v38 = vmax.f32 %v244_v27, 0.0  ;;  %v271_v44 = vmax.f32 %v149_v30, 0.0 }
  0xde   :  { %v153_v34 = vadd.f32 %v152_v31, %v39_v26  ;;  %v248_v35 = vadd.f32 %v247_v32, %v39_v26  ;;  %v154_v36 = vpop.f32.mrb[3].mxu0  ;;  %v249_v37 = vpop.f32.mrb[3].mxu1 }
  0xdf   :  { %v155_v39 = vadd.f32 %v154_v36, %v39_v26  ;;  %v250_v40 = vadd.f32 %v249_v37, %v39_v26  ;;  %v1589_v26 = vpop.permute.xlu0 %303 }
  0xe0   :  { %v274_v42 = vmax.f32 %v153_v34, 0.0  ;;  %v276_v43 = vmax.f32 %v248_v35, 0.0 }
  0xe1   :  { %v275_v45 = vmax.f32 %v155_v39, 0.0  ;;  %v277_v46 = vmax.f32 %v250_v40, 0.0  ;;  %v158_v47 = vpop.f32.mrb[4].mxu0  ;;  %v253_v48 = vpop.f32.mrb[4].mxu1 }
  0xe2   :  { %v1322_v49 = vpack.c.bf16 %v274_v42, %v270_v41  ;;  %v1330_v50 = vpack.c.bf16 %v276_v43, %v272_v33  ;;  %v160_v51 = vpop.f32.mrb[5].mxu0  ;;  %v255_v52 = vpop.f32.mrb[5].mxu1  ;;  %v159_v55 = vadd.f32 %v158_v47, %v44_v29  ;;  %v254_v56 = vadd.f32 %v253_v48, %v44_v29 }
  0xe3   :  { %v1320_v53 = vpack.c.bf16 %v275_v45, %v271_v44  ;;  %v1328_v54 = vpack.c.bf16 %v277_v46, %v273_v38  ;;  %v161_v58 = vadd.f32 %v160_v51, %v44_v29  ;;  %v256_v59 = vadd.f32 %v255_v52, %v44_v29  ;;  %v294_v40 = vpop.permute.xlu1 %293 }
  0xe4   :  { %v278_v5 = vmax.f32 %v159_v55, 0.0  ;;  %v280_v6 = vmax.f32 %v254_v56, 0.0 }
  0xe5   :  { %v164_v60 = vpop.f32.mrb[6].mxu0  ;;  %v259_v61 = vpop.f32.mrb[6].mxu1  ;;  %1321 = vmatprep.subr.bf16.mxu1 %v1320_v53  ;;  %v279_v9 = vmax.f32 %v161_v58, 0.0  ;;  %v281_v10 = vmax.f32 %v256_v59, 0.0 }
  0xe6   :  { %v165_v62 = vadd.f32 %v164_v60, %v49_v57  ;;  %v260_v63 = vadd.f32 %v259_v61, %v49_v57  ;;  %v166_v0 = vpop.f32.mrb[7].mxu0  ;;  %v261_v1 = vpop.f32.mrb[7].mxu1  ;;  %1323 = vmatpush1.bf16.msra.mxu1 %v1322_v49 }
  0xe7   :  { %v167_v2 = vadd.f32 %v166_v0, %v49_v57  ;;  %v262_v3 = vadd.f32 %v261_v1, %v49_v57  ;;  %v299_v52 = vpop.permute.xlu1 %298 }
  0xe8   :  { %v282_v7 = vmax.f32 %v165_v62, 0.0  ;;  %v284_v8 = vmax.f32 %v260_v63, 0.0 }
  0xe9   :  { %v283_v13 = vmax.f32 %v167_v2, 0.0  ;;  %v285_v20 = vmax.f32 %v262_v3, 0.0  ;;  %v265_v28 = vpop.f32.mrb[8].mxu1  ;;  %v170_v29 = vpop.f32.mrb[8].mxu0 }
  0xea   :  { %v1326_v21 = vpack.c.bf16 %v282_v7, %v278_v5  ;;  %v1334_v22 = vpack.c.bf16 %v284_v8, %v280_v6  ;;  %v267_v31 = vpop.f32.mrb[9].mxu1  ;;  %v172_v32 = vpop.f32.mrb[9].mxu0 }
  0xeb   :  { %v1324_v23 = vpack.c.bf16 %v283_v13, %v279_v9  ;;  %v1332_v24 = vpack.c.bf16 %v285_v20, %v281_v10 }
  0xed   :  { %1325 = vmatprep.subr.bf16.mxu1 %v1324_v23 }
  0xee   :  { %1327 = vmatpush1.bf16.msra.mxu1 %v1326_v21 }
  0xef   :  { %1329 = vmatprep.subr.bf16.mxu1 %v1328_v54 }
  0xf1   :  { %1267 = vmatmul.mubr.msk.f32.vlgmr.msra.gmra.mrb[10].mxu1 %vm306_vm2, %v1520_v11 }
  0xf2   :  { %1331 = vmatpush1.bf16.msra.mxu1 %v1330_v50  ;;  %385 = vmatprep.mubr.f32.mxu1 %v1444_v4 }
  0xf3   :  { %1333 = vmatprep.subr.bf16.mxu1 %v1332_v24 }
  0xf5   :  { %1268 = vmatmul.mubr.msk.f32.gmra.mrb[12].mxu1 %vm306_vm2, %v1525_v12 }
  0xf6   :  { %1335 = vmatpush1.bf16.msra.mxu1 %v1334_v22  ;;  %391 = vmatprep.mubr.f32.mxu1 %v1444_v4 }
  0xf9   :  { %1269 = vmatmul.mubr.msk.f32.gmra.mrb[14].mxu1 %vm306_vm2, %v1532_v14 }
  0xfa   :  { %397 = vmatprep.mubr.f32.mxu1 %v1444_v4 }
  0xfd   :  { %1270 = vmatmul.mubr.msk.f32.gmra.mrb[16].mxu1 %vm306_vm2, %v1537_v15 }
  0xfe   :  { %468 = vmatprep.mubr.f32.mxu1 %v1444_v4 }
 0x101   :  { %1271 = vmatmul.mubr.msk.f32.vlgmr.msra.gmra.mrb[18].mxu1 %vm306_vm2, %v1520_v11  ;;  %v1591_v11 = vpop.permute.xlu0 %516 }
 0x102   :  { %474 = vmatprep.mubr.f32.mxu1 %v1444_v4 }
 0x105   :  { %1272 = vmatmul.mubr.msk.f32.gmra.mrb[20].mxu1 %vm306_vm2, %v1525_v12  ;;  %v1593_v27 = vpop.permute.xlu0 %526 }
 0x106   :  { %480 = vmatprep.mubr.f32.mxu1 %v1444_v4 }
 0x109   :  { %1273 = vmatmul.mubr.msk.f32.gmra.mrb[22].mxu1 %vm306_vm2, %v1532_v14  ;;  %v54_v12 = vpop.permute.xlu0 %53 }
 0x10a   :  { %486 = vmatprep.mubr.f32.mxu1 %v1444_v4  ;;  %v266_v30 = vadd.f32 %v265_v28, %v54_v12  ;;  %v171_v14 = vadd.f32 %v170_v29, %v54_v12  ;;  %v268_v33 = vadd.f32 %v267_v31, %v54_v12  ;;  %v173_v34 = vadd.f32 %v172_v32, %v54_v12 }
 0x10c   :  { %v888_v35 = vrot.slane %v268_v33, 7 }
 0x10d   :  { %1274 = vmatmul.mubr.msk.f32.gmra.mrb[24].mxu1 %vm306_vm2, %v1537_v15  ;;  %v887_v15 = vrot.slane %v266_v30, 7 }
 0x10e   :  { %690 = vmatprep.mubr.f32.mxu1 %v1444_v4  ;;  %v1599_v37 = vsel %vm882_vm3, %v173_v34, %v888_v35 }
 0x10f   :  { %v1596_v36 = vsel %vm882_vm3, %v171_v14, %v887_v15 }
 0x1c4   :  { %v381_v38 = vpop.f32.mrb[10].mxu1 }
 0x1c5   :  { %v383_v39 = vpop.f32.mrb[11].mxu1  ;;  %v382_v41 = vadd.f32 %v381_v38, %v289_v25 }
 0x1c6   :  { %v384_v42 = vadd.f32 %v383_v39, %v289_v25 }
 0x1c7   :  { %v493_v47 = vmax.f32 %v382_v41, 0.0 }
 0x1c8   :  { %v387_v43 = vpop.f32.mrb[12].mxu1  ;;  %v494_v49 = vmax.f32 %v384_v42, 0.0 }
 0x1c9   :  { %v388_v44 = vadd.f32 %v387_v43, %v294_v40  ;;  %v389_v45 = vpop.f32.mrb[13].mxu1 }
 0x1ca   :  { %v390_v46 = vadd.f32 %v389_v45, %v294_v40 }
 0x1cb   :  { %v497_v48 = vmax.f32 %v388_v44, 0.0 }
 0x1cc   :  { %v498_v50 = vmax.f32 %v390_v46, 0.0  ;;  %v393_v51 = vpop.f32.mrb[14].mxu1 }
 0x1cd   :  { %v1338_v53 = vpack.c.bf16 %v497_v48, %v493_v47  ;;  %v395_v54 = vpop.f32.mrb[15].mxu1  ;;  %v394_v56 = vadd.f32 %v393_v51, %v299_v52 }
 0x1ce   :  { %v1336_v55 = vpack.c.bf16 %v498_v50, %v494_v49  ;;  %v396_v58 = vadd.f32 %v395_v54, %v299_v52 }
 0x1cf   :  { %v501_v62 = vmax.f32 %v394_v56, 0.0 }
 0x1d0   :  { %v399_v57 = vpop.f32.mrb[16].mxu1  ;;  %1337 = vmatprep.subr.bf16.mxu0 %v1336_v55  ;;  %v502_v0 = vmax.f32 %v396_v58, 0.0 }
 0x1d1   :  { %v400_v59 = vadd.f32 %v399_v57, %v1589_v26  ;;  %v401_v60 = vpop.f32.mrb[17].mxu1  ;;  %1339 = vmatpush1.bf16.msra.mxu0 %v1338_v53 }
 0x1d2   :  { %v402_v61 = vadd.f32 %v401_v60, %v1589_v26 }
 0x1d3   :  { %v505_v63 = vmax.f32 %v400_v59, 0.0 }
 0x1d4   :  { %v506_v1 = vmax.f32 %v402_v61, 0.0  ;;  %v470_v2 = vpop.f32.mrb[18].mxu1 }
 0x1d5   :  { %v1342_v3 = vpack.c.bf16 %v505_v63, %v501_v62  ;;  %v472_v5 = vpop.f32.mrb[19].mxu1  ;;  %v471_v7 = vadd.f32 %v470_v2, %v289_v25 }
 0x1d6   :  { %v1340_v6 = vpack.c.bf16 %v506_v1, %v502_v0  ;;  %v473_v8 = vadd.f32 %v472_v5, %v289_v25 }
 0x1d7   :  { %v495_v21 = vmax.f32 %v471_v7, 0.0 }
 0x1d8   :  { %v476_v9 = vpop.f32.mrb[20].mxu1  ;;  %1341 = vmatprep.subr.bf16.mxu0 %v1340_v6  ;;  %v496_v23 = vmax.f32 %v473_v8, 0.0 }
 0x1d9   :  { %v477_v10 = vadd.f32 %v476_v9, %v294_v40  ;;  %v478_v13 = vpop.f32.mrb[21].mxu1  ;;  %1343 = vmatpush1.bf16.msra.mxu0 %v1342_v3 }
 0x1da   :  { %v479_v20 = vadd.f32 %v478_v13, %v294_v40  ;;  %v30_v13 = vld [vmem:[%s1881_s1 + $0x68] sm:$0x1] }
 0x1db   :  { %v499_v22 = vmax.f32 %v477_v10, 0.0 }
 0x1dc   :  { %v500_v24 = vmax.f32 %v479_v20, 0.0  ;;  %v482_v12 = vpop.f32.mrb[22].mxu1  ;;  %1275 = vmatmul.mubr.msk.f32.vlgmr.msra.gmra.mrb[10].mxu0 %vm306_vm2, %v1549_v17 }
 0x1dd   :  { %v1346_v28 = vpack.c.bf16 %v499_v22, %v495_v21  ;;  %v484_v29 = vpop.f32.mrb[23].mxu1  ;;  %607 = vmatprep.mubr.f32.mxu0 %v1444_v4  ;;  %v483_v25 = vadd.f32 %v482_v12, %v299_v52 }
 0x1de   :  { %v1344_v30 = vpack.c.bf16 %v500_v24, %v496_v23  ;;  %v485_v31 = vadd.f32 %v484_v29, %v299_v52 }
 0x1df   :  { %v503_v15 = vmax.f32 %v483_v25, 0.0 }
 0x1e0   :  { %v488_v14 = vpop.f32.mrb[24].mxu1  ;;  %1276 = vmatmul.mubr.msk.f32.gmra.mrb[12].mxu0 %vm306_vm2, %v1544_v16  ;;  %1345 = vmatprep.subr.bf16.mxu1 %v1344_v30  ;;  %v504_v38 = vmax.f32 %v485_v31, 0.0 }
 0x1e1   :  { %v489_v32 = vadd.f32 %v488_v14, %v1589_v26  ;;  %v490_v33 = vpop.f32.mrb[25].mxu1  ;;  %1347 = vmatpush1.bf16.msra.mxu1 %v1346_v28  ;;  %613 = vmatprep.mubr.f32.mxu0 %v1444_v4 }
 0x1e2   :  { %v491_v34 = vadd.f32 %v490_v33, %v1589_v26 }
 0x1e3   :  { %v507_v35 = vmax.f32 %v489_v32, 0.0 }
 0x1e4   :  { %v508_v39 = vmax.f32 %v491_v34, 0.0  ;;  %1277 = vmatmul.mubr.msk.f32.gmra.mrb[14].mxu0 %vm306_vm2, %v1561_v19 }
 0x1e5   :  { %v1350_v40 = vpack.c.bf16 %v507_v35, %v503_v15  ;;  %619 = vmatprep.mubr.f32.mxu0 %v1444_v4 }
 0x1e6   :  { %v1348_v41 = vpack.c.bf16 %v508_v39, %v504_v38 }
 0x1e8   :  { %1278 = vmatmul.mubr.msk.f32.gmra.mrb[16].mxu0 %vm306_vm2, %v1556_v18  ;;  %1349 = vmatprep.subr.bf16.mxu1 %v1348_v41  ;;  %v905_v41 = vlaneseq }
 0x1e9   :  { %1351 = vmatpush1.bf16.msra.mxu1 %v1350_v40  ;;  %798 = vmatprep.mubr.f32.mxu0 %v1444_v4 }
 0x1ec   :  { %1279 = vmatmul.mubr.msk.f32.vlgmr.msra.gmra.mrb[26].mxu1 %vm306_vm2, %v1549_v17  ;;  %v512_v17 = vpop.permute.xlu1 %511 }
 0x1ed   :  { %696 = vmatprep.mubr.f32.mxu1 %v1444_v4 }
 0x1f0   :  { %1280 = vmatmul.mubr.msk.f32.gmra.mrb[28].mxu1 %vm306_vm2, %v1544_v16  ;;  %v522_v53 = vpop.permute.xlu1 %521 }
 0x1f1   :  { %702 = vmatprep.mubr.f32.mxu1 %v1444_v4 }
 0x1f4   :  { %1281 = vmatmul.mubr.msk.f32.gmra.mrb[30].mxu1 %vm306_vm2, %v1561_v19 }
 0x1f5   :  { %708 = vmatprep.mubr.f32.mxu1 %v1444_v4 }
 0x1f8   :  { %1282 = vmatmul.mubr.msk.f32.gmra.mrb[32].mxu1 %vm306_vm2, %v1556_v18 }
 0x1f9   :  { %869 = vmatprep.mubr.f32.mxu1 %v1444_v4 }
 0x2af   :  { %v603_v26 = vpop.f32.mrb[10].mxu0 }
 0x2b0   :  { %v605_v42 = vpop.f32.mrb[11].mxu0  ;;  %v604_v43 = vadd.f32 %v603_v26, %v512_v17  ;;  %v1642_v26 = vshrl.u32 %v905_v41, 7 }
 0x2b1   :  { %v606_v44 = vadd.f32 %v605_v42, %v512_v17  ;;  %v1644_v42 = vand.u32 127, %v905_v41 }
 0x2b2   :  { %v715_v48 = vmax.f32 %v604_v43, 0.0  ;;  %v923_v43 = vadd.s32 136, %v1642_v26 }
 0x2b3   :  { %v609_v45 = vpop.f32.mrb[12].mxu0  ;;  %v716_v49 = vmax.f32 %v606_v44, 0.0  ;;  %vm1068_vm4 = vcmp.eq.s32.totalorder %v1644_v42, 0  ;;  %vm1069_vm5 = vcmp.eq.s32.totalorder %v1644_v42, 1  ;;  %vm1070_vm6 = vcmp.eq.s32.totalorder %v1644_v42, 2 }
 0x2b4   :  { %v610_v16 = vadd.f32 %v609_v45, %v1591_v11  ;;  %v611_v46 = vpop.f32.mrb[13].mxu0  ;;  %v940_v44 = vand.u32 15, %v1642_v26  ;;  %v1004_v45 = vshra.s32 %v1642_v26, 4 }
 0x2b5   :  { %v612_v47 = vadd.f32 %v611_v46, %v1591_v11  ;;  %v957_v46 = vand.u32 15, %v923_v43 }
 0x2b6   :  { %v719_v19 = vmax.f32 %v610_v16, 0.0 }
 0x2b7   :  { %v720_v50 = vmax.f32 %v612_v47, 0.0  ;;  %v615_v51 = vpop.f32.mrb[14].mxu0 }
 0x2b8   :  { %v1354_v52 = vpack.c.bf16 %v719_v19, %v715_v48  ;;  %v617_v18 = vpop.f32.mrb[15].mxu0  ;;  %v616_v55 = vadd.f32 %v615_v51, %v522_v53  ;;  %v1021_v48 = vshra.s32 %v923_v43, 4  ;;  %v1657_v19 = vsel %vm1070_vm6, 1.0, %v1444_v4 }
 0x2b9   :  { %v1352_v54 = vpack.c.bf16 %v720_v50, %v716_v49  ;;  %v618_v56 = vadd.f32 %v617_v18, %v522_v53  ;;  %v972_v50 = vcvt.s32.f32 %v940_v44  ;;  %v989_v18 = vcvt.s32.f32 %v957_v46 }
 0x2ba   :  { %v723_v61 = vmax.f32 %v616_v55, 0.0 }
 0x2bb   :  { %v621_v57 = vpop.f32.mrb[16].mxu0  ;;  %1353 = vmatprep.subr.bf16.mxu0 %v1352_v54  ;;  %v724_v63 = vmax.f32 %v618_v56, 0.0  ;;  %v1053_v54 = vcvt.s32.f32 %v1021_v48  ;;  %v1036_v56 = vcvt.s32.f32 %v1004_v45  ;;  %v911_v48 = vadd.s32 40, %v1642_v26 }
 0x2bc   :  { %v622_v58 = vadd.f32 %v621_v57, %v1593_v27  ;;  %v623_v59 = vpop.f32.mrb[17].mxu0  ;;  %1355 = vmatpush1.bf16.msra.mxu0 %v1354_v52 }
 0x2bd   :  { %v624_v60 = vadd.f32 %v623_v59, %v1593_v27  ;;  %v1089_v4 = vsel %vm1069_vm5, %v1053_v54, %v1657_v19 }
 0x2be   :  { %v727_v62 = vmax.f32 %v622_v58, 0.0  ;;  %v924_v58 = vadd.s32 144, %v1642_v26 }
 0x2bf   :  { %v728_v0 = vmax.f32 %v624_v60, 0.0  ;;  %v692_v1 = vpop.f32.mrb[26].mxu1  ;;  %v925_v60 = vadd.s32 152, %v1642_v26 }
 0x2c0   :  { %v1358_v2 = vpack.c.bf16 %v727_v62, %v723_v61  ;;  %v694_v3 = vpop.f32.mrb[27].mxu1  ;;  %v693_v6 = vadd.f32 %v692_v1, %v512_v17  ;;  %v908_v61 = vadd.s32 16, %v1642_v26 }
 0x2c1   :  { %v1356_v5 = vpack.c.bf16 %v728_v0, %v724_v63  ;;  %v695_v7 = vadd.f32 %v694_v3, %v512_v17  ;;  %v922_v17 = vadd.s32 128, %v1642_v26  ;;  %v1121_v63 = vsel %vm1068_vm4, %v989_v18, %v1089_v4 }
 0x2c2   :  { %v717_v21 = vmax.f32 %v693_v6, 0.0  ;;  %v1072_v0 = vsel %vm1069_vm5, %v1036_v56, %v1657_v19  ;;  %v958_v6 = vand.u32 15, %v924_v58 }
 0x2c3   :  { %v698_v8 = vpop.f32.mrb[28].mxu1  ;;  %1357 = vmatprep.subr.bf16.mxu0 %v1356_v5  ;;  %v718_v23 = vmax.f32 %v695_v7, 0.0  ;;  %v956_v16 = vand.u32 15, %v922_v17  ;;  %v1020_v47 = vshra.s32 %v922_v17, 4  ;;  %v1104_v3 = vsel %vm1068_vm4, %v972_v50, %v1072_v0 }
 0x2c4   :  { %v699_v9 = vadd.f32 %v698_v8, %v1591_v11  ;;  %v700_v10 = vpop.f32.mrb[29].mxu1  ;;  %1359 = vmatpush1.bf16.msra.mxu0 %v1358_v2  ;;  %v959_v8 = vand.u32 15, %v925_v60 }
 0x2c5   :  { %v701_v20 = vadd.f32 %v700_v10, %v1591_v11  ;;  %v988_v52 = vcvt.s32.f32 %v956_v16  ;;  %v1023_v10 = vshra.s32 %v925_v60, 4 }
 0x2c6   :  { %v721_v22 = vmax.f32 %v699_v9, 0.0  ;;  %v1022_v9 = vshra.s32 %v924_v58, 4  ;;  %v929_v58 = vadd.s32 184, %v1642_v26 }
 0x2c7   :  { %v722_v24 = vmax.f32 %v701_v20, 0.0  ;;  %v704_v12 = vpop.f32.mrb[30].mxu1  ;;  %1283 = vmatmul.mubr.msk.f32.vlgmr.msra.gmra.mrb[18].mxu0 %vm306_vm2, %v30_v13  ;;  %v909_v20 = vadd.s32 24, %v1642_v26 }
 0x2c8   :  { %v1362_v28 = vpack.c.bf16 %v721_v22, %v717_v21  ;;  %v706_v29 = vpop.f32.mrb[31].mxu1  ;;  %v705_v25 = vadd.f32 %v704_v12, %v522_v53  ;;  %v942_v21 = vand.u32 15, %v908_v61  ;;  %v1006_v22 = vshra.s32 %v908_v61, 4 }
 0x2c9   :  { %v1360_v30 = vpack.c.bf16 %v722_v24, %v718_v23  ;;  %v707_v31 = vadd.f32 %v706_v29, %v522_v53  ;;  %v1052_v53 = vcvt.s32.f32 %v1020_v47  ;;  %v991_v23 = vcvt.s32.f32 %v959_v8 }
 0x2ca   :  { %v725_v34 = vmax.f32 %v705_v25, 0.0  ;;  %v1054_v24 = vcvt.s32.f32 %v1022_v9  ;;  %v1055_v12 = vcvt.s32.f32 %v1023_v10  ;;  %v943_v29 = vand.u32 15, %v909_v20 }
 0x2cb   :  { %v710_v14 = vpop.f32.mrb[32].mxu1  ;;  %1361 = vmatprep.subr.bf16.mxu1 %v1360_v30  ;;  %v726_v35 = vmax.f32 %v707_v31, 0.0  ;;  %v1088_v59 = vsel %vm1069_vm5, %v1052_v53, %v1657_v19  ;;  %v974_v30 = vcvt.s32.f32 %v942_v21  ;;  %v1007_v25 = vshra.s32 %v909_v20, 4 }
 0x2cc   :  { %v711_v32 = vadd.f32 %v710_v14, %v1593_v27  ;;  %v712_v33 = vpop.f32.mrb[33].mxu1  ;;  %1363 = vmatpush1.bf16.msra.mxu1 %v1362_v28  ;;  %v1120_v62 = vsel %vm1068_vm4, %v988_v52, %v1088_v59  ;;  %v926_v28 = vadd.s32 160, %v1642_v26  ;;  %v1038_v31 = vcvt.s32.f32 %v1006_v22 }
 0x2cd   :  { %v713_v11 = vadd.f32 %v712_v33, %v1593_v27  ;;  %v907_v27 = vadd.s32 8, %v1642_v26  ;;  %v1368_v2 = vpack.c.bf16 %v1121_v63, %v1120_v62  ;;  %v1090_v14 = vsel %vm1069_vm5, %v1054_v24, %v1657_v19 }
 0x2ce   :  { %v729_v15 = vmax.f32 %v711_v32, 0.0  ;;  %v1091_v32 = vsel %vm1069_vm5, %v1055_v12, %v1657_v19  ;;  %v927_v33 = vadd.s32 168, %v1642_v26  ;;  %v1024_v44 = vshra.s32 %v926_v28, 4 }
 0x2cf   :  { %v730_v38 = vmax.f32 %v713_v11, 0.0  ;;  %v941_v49 = vand.u32 15, %v907_v27  ;;  %v1005_v51 = vshra.s32 %v907_v27, 4  ;;  %1369 = vmatprep.subr.bf16.mxu0 %v1368_v2  ;;  %v960_v11 = vand.u32 15, %v926_v28 }
 0x2d0   :  { %v1366_v39 = vpack.c.bf16 %v729_v15, %v725_v34  ;;  %v1123_v15 = vsel %vm1068_vm4, %v991_v23, %v1091_v32  ;;  %v961_v41 = vand.u32 15, %v927_v33  ;;  %v1025_v45 = vshra.s32 %v927_v33, 4 }
 0x2d1   :  { %v1364_v40 = vpack.c.bf16 %v730_v38, %v726_v35  ;;  %v973_v55 = vcvt.s32.f32 %v941_v49  ;;  %v1037_v57 = vcvt.s32.f32 %v1005_v51  ;;  %v975_v35 = vcvt.s32.f32 %v943_v29 }
 0x2d2   :  { %v1039_v38 = vcvt.s32.f32 %v1007_v25  ;;  %v992_v17 = vcvt.s32.f32 %v960_v11  ;;  %v993_v46 = vcvt.s32.f32 %v961_v41  ;;  %v910_v47 = vadd.s32 32, %v1642_v26 }
 0x2d3   :  { %1365 = vmatprep.subr.bf16.mxu1 %v1364_v40  ;;  %v1073_v1 = vsel %vm1069_vm5, %v1037_v57, %v1657_v19  ;;  %v1074_v40 = vsel %vm1069_vm5, %v1038_v31, %v1657_v19  ;;  %v1056_v50 = vcvt.s32.f32 %v1024_v44  ;;  %v1057_v51 = vcvt.s32.f32 %v1025_v45 }
 0x2d4   :  { %1367 = vmatpush1.bf16.msra.mxu1 %v1366_v39  ;;  %v1105_v5 = vsel %vm1068_vm4, %v973_v55, %v1073_v1  ;;  %v1075_v43 = vsel %vm1069_vm5, %v1039_v38, %v1657_v19  ;;  %v1106_v27 = vsel %vm1068_vm4, %v974_v30, %v1074_v40  ;;  %v928_v52 = vadd.s32 176, %v1642_v26 }
 0x2d5   :  { %v1370_v7 = vpack.c.bf16 %v1105_v5, %v1104_v3  ;;  %v1107_v16 = vsel %vm1068_vm4, %v975_v35, %v1075_v43  ;;  %v944_v18 = vand.u32 15, %v910_v47  ;;  %v945_v53 = vand.u32 15, %v911_v48 }
 0x2d6   :  { %v1374_v49 = vpack.c.bf16 %v1107_v16, %v1106_v27  ;;  %v1008_v54 = vshra.s32 %v910_v47, 4  ;;  %v1009_v55 = vshra.s32 %v911_v48, 4  ;;  %v1092_v56 = vsel %vm1069_vm5, %v1056_v50, %v1657_v19 }
 0x2d7   :  { %1284 = vmatmul.mubr.msk.f32.vlgmr.msra.gmra.mrb[34].mxu1 %vm306_vm2, %v30_v13  ;;  %v990_v13 = vcvt.s32.f32 %v958_v6  ;;  %1371 = vmatpush3.bf16.msra.mxu0 %v1370_v7  ;;  %v1093_v57 = vsel %vm1069_vm5, %v1057_v51, %v1657_v19  ;;  %v962_v59 = vand.u32 15, %v928_v52  ;;  %v1124_v4 = vsel %vm1068_vm4, %v992_v17, %v1092_v56 }
 0x2d8   :  { %v1125_v60 = vsel %vm1068_vm4, %v993_v46, %v1093_v57  ;;  %v976_v61 = vcvt.s32.f32 %v944_v18  ;;  %v977_v62 = vcvt.s32.f32 %v945_v53  ;;  %v1040_v0 = vcvt.s32.f32 %v1008_v54 }
 0x2d9   :  { %v1122_v34 = vsel %vm1068_vm4, %v990_v13, %v1090_v14  ;;  %v1376_v63 = vpack.c.bf16 %v1125_v60, %v1124_v4  ;;  %v1041_v1 = vcvt.s32.f32 %v1009_v55  ;;  %v963_v2 = vand.u32 15, %v929_v58 }
 0x2da   :  { %v1372_v39 = vpack.c.bf16 %v1123_v15, %v1122_v34  ;;  %v994_v3 = vcvt.s32.f32 %v962_v59  ;;  %v1026_v5 = vshra.s32 %v928_v52, 4  ;;  %v1027_v6 = vshra.s32 %v929_v58, 4 }
 0x2db   :  { %v912_v7 = vadd.s32 48, %v1642_v26  ;;  %v1076_v8 = vsel %vm1069_vm5, %v1040_v0, %v1657_v19  ;;  %v1077_v9 = vsel %vm1069_vm5, %v1041_v1, %v1657_v19  ;;  %v995_v10 = vcvt.s32.f32 %v963_v2 }
 0x2dc   :  { %1373 = vmatprep.subr.bf16.mxu0 %v1372_v39  ;;  %v913_v13 = vadd.s32 56, %v1642_v26  ;;  %v1108_v20 = vsel %vm1068_vm4, %v976_v61, %v1076_v8  ;;  %v1109_v21 = vsel %vm1068_vm4, %v977_v62, %v1077_v9  ;;  %v1058_v22 = vcvt.s32.f32 %v1026_v5 }
 0x2dd   :  { %1375 = vmatpush3.bf16.msra.mxu0 %v1374_v49  ;;  %v1059_v23 = vcvt.s32.f32 %v1027_v6  ;;  %v1378_v24 = vpack.c.bf16 %v1109_v21, %v1108_v20  ;;  %v946_v12 = vand.u32 15, %v912_v7  ;;  %v1010_v29 = vshra.s32 %v912_v7, 4 }
 0x2de   :  { %1377 = vmatprep.subr.bf16.mxu0 %v1376_v63  ;;  %v947_v28 = vand.u32 15, %v913_v13  ;;  %v1094_v30 = vsel %vm1069_vm5, %v1058_v22, %v1657_v19  ;;  %v1011_v31 = vshra.s32 %v913_v13, 4  ;;  %v930_v52 = vadd.s32 192, %v1642_v26 }
 0x2df   :  { %v1095_v25 = vsel %vm1069_vm5, %v1059_v23, %v1657_v19  ;;  %v1126_v14 = vsel %vm1068_vm4, %v994_v3, %v1094_v30  ;;  %v978_v33 = vcvt.s32.f32 %v946_v12  ;;  %v1042_v15 = vcvt.s32.f32 %v1010_v29 }
 0x2e0   :  { %v1127_v32 = vsel %vm1068_vm4, %v995_v10, %v1095_v25  ;;  %v979_v11 = vcvt.s32.f32 %v947_v28  ;;  %v1043_v35 = vcvt.s32.f32 %v1011_v31  ;;  %v931_v18 = vadd.s32 200, %v1642_v26 }
 0x2e1   :  { %1379 = vmatpush3.bf16.msra.mxu0 %v1378_v24  ;;  %v1380_v34 = vpack.c.bf16 %v1127_v32, %v1126_v14  ;;  %v1078_v38 = vsel %vm1069_vm5, %v1042_v15, %v1657_v19  ;;  %v914_v53 = vadd.s32 64, %v1642_v26  ;;  %v915_v54 = vadd.s32 72, %v1642_v26 }
 0x2e2   :  { %v1079_v39 = vsel %vm1069_vm5, %v1043_v35, %v1657_v19  ;;  %v1110_v40 = vsel %vm1068_vm4, %v978_v33, %v1078_v38  ;;  %v1028_v55 = vshra.s32 %v930_v52, 4  ;;  %v1029_v56 = vshra.s32 %v931_v18, 4 }
 0x2e3   :  { %1381 = vmatprep.subr.bf16.mxu0 %v1380_v34  ;;  %v1111_v41 = vsel %vm1068_vm4, %v979_v11, %v1079_v39  ;;  %v964_v57 = vand.u32 15, %v930_v52  ;;  %v965_v58 = vand.u32 15, %v931_v18  ;;  %v1012_v59 = vshra.s32 %v914_v53, 4 }
 0x2e4   :  { %v1382_v17 = vpack.c.bf16 %v1111_v41, %v1110_v40  ;;  %v1013_v4 = vshra.s32 %v915_v54, 4  ;;  %v1060_v60 = vcvt.s32.f32 %v1028_v55  ;;  %v1061_v61 = vcvt.s32.f32 %v1029_v56 }
 0x2e5   :  { %v948_v62 = vand.u32 15, %v914_v53  ;;  %v949_v63 = vand.u32 15, %v915_v54  ;;  %v996_v0 = vcvt.s32.f32 %v964_v57  ;;  %v997_v1 = vcvt.s32.f32 %v965_v58 }
 0x2e6   :  { %1383 = vmatpush3.bf16.msra.mxu0 %v1382_v17  ;;  %v1044_v2 = vcvt.s32.f32 %v1012_v59  ;;  %v1045_v3 = vcvt.s32.f32 %v1013_v4  ;;  %v1096_v5 = vsel %vm1069_vm5, %v1060_v60, %v1657_v19  ;;  %v1097_v6 = vsel %vm1069_vm5, %v1061_v61, %v1657_v19 }
 0x2e7   :  { %v980_v7 = vcvt.s32.f32 %v948_v62  ;;  %v981_v8 = vcvt.s32.f32 %v949_v63  ;;  %v1128_v9 = vsel %vm1068_vm4, %v996_v0, %v1096_v5  ;;  %v1129_v10 = vsel %vm1068_vm4, %v997_v1, %v1097_v6 }
 0x2e8   :  { %v1080_v13 = vsel %vm1069_vm5, %v1044_v2, %v1657_v19  ;;  %v1081_v20 = vsel %vm1069_vm5, %v1045_v3, %v1657_v19  ;;  %v1384_v21 = vpack.c.bf16 %v1129_v10, %v1128_v9  ;;  %v932_v24 = vadd.s32 208, %v1642_v26 }
 0x2e9   :  { %v1112_v22 = vsel %vm1068_vm4, %v980_v7, %v1080_v13  ;;  %v1113_v23 = vsel %vm1068_vm4, %v981_v8, %v1081_v20  ;;  %v933_v28 = vadd.s32 216, %v1642_v26  ;;  %v916_v29 = vadd.s32 80, %v1642_v26 }
 0x2ea   :  { %v1386_v12 = vpack.c.bf16 %v1113_v23, %v1112_v22  ;;  %v917_v30 = vadd.s32 88, %v1642_v26  ;;  %1385 = vmatprep.subr.bf16.mxu0 %v1384_v21  ;;  %v966_v25 = vand.u32 15, %v932_v24  ;;  %v1030_v31 = vshra.s32 %v932_v24, 4 }
 0x2eb   :  { %v934_v14 = vadd.s32 224, %v1642_v26  ;;  %v935_v32 = vadd.s32 232, %v1642_v26  ;;  %v967_v33 = vand.u32 15, %v933_v28  ;;  %v1031_v11 = vshra.s32 %v933_v28, 4 }
 0x2ec   :  { %1387 = vmatpush3.bf16.msra.mxu0 %v1386_v12  ;;  %v950_v34 = vand.u32 15, %v916_v29  ;;  %v951_v15 = vand.u32 15, %v917_v30  ;;  %v998_v35 = vcvt.s32.f32 %v966_v25  ;;  %v1062_v38 = vcvt.s32.f32 %v1030_v31 }
 0x2ed   :  { %v1014_v39 = vshra.s32 %v916_v29, 4  ;;  %v1015_v40 = vshra.s32 %v917_v30, 4  ;;  %v999_v41 = vcvt.s32.f32 %v967_v33  ;;  %v1063_v17 = vcvt.s32.f32 %v1031_v11 }
 0x2ee   :  { %v1032_v52 = vshra.s32 %v934_v14, 4  ;;  %v1033_v60 = vshra.s32 %v935_v32, 4  ;;  %v918_v62 = vadd.s32 96, %v1642_v26  ;;  %v919_v63 = vadd.s32 104, %v1642_v26 }
 0x2ef   :  { %v936_v0 = vadd.s32 240, %v1642_v26  ;;  %v937_v1 = vadd.s32 248, %v1642_v26  ;;  %v920_v2 = vadd.s32 112, %v1642_v26 }
 0x2f0   :  { %v1064_v61 = vcvt.s32.f32 %v1032_v52  ;;  %v1065_v3 = vcvt.s32.f32 %v1033_v60  ;;  %v952_v6 = vand.u32 15, %v918_v62  ;;  %v1016_v7 = vshra.s32 %v918_v62, 4 }
 0x2f1   :  { %v953_v9 = vand.u32 15, %v919_v63  ;;  %v1017_v10 = vshra.s32 %v919_v63, 4  ;;  %v970_v13 = vand.u32 15, %v936_v0  ;;  %v971_v23 = vand.u32 15, %v937_v1 }
 0x2f2   :  { %v1100_v5 = vsel %vm1069_vm5, %v1064_v61, %v1657_v19  ;;  %v1101_v20 = vsel %vm1069_vm5, %v1065_v3, %v1657_v19  ;;  %v984_v21 = vcvt.s32.f32 %v952_v6  ;;  %v1048_v22 = vcvt.s32.f32 %v1016_v7 }
 0x2f3   :  { %v985_v12 = vcvt.s32.f32 %v953_v9  ;;  %v1049_v28 = vcvt.s32.f32 %v1017_v10  ;;  %v1002_v29 = vcvt.s32.f32 %v970_v13  ;;  %v1003_v31 = vcvt.s32.f32 %v971_v23 }
 0x2f4   :  { %v1084_v25 = vsel %vm1069_vm5, %v1048_v22, %v1657_v19  ;;  %v1035_v11 = vshra.s32 %v937_v1, 4  ;;  %v1139_v63 = vrot.slane %v1599_v37, 6  ;;  %v1448_v3 = vmov 2  }
 0x2f5   :  { %v1116_v33 = vsel %vm1068_vm4, %v984_v21, %v1084_v25  ;;  %1411 = vset.pattern.permute.xlu0 %v1448_v3 }
 0x39a   :  { %v800_v43 = vpop.f32.mrb[18].mxu0 }
 0x39b   :  { %v802_v27 = vpop.f32.mrb[19].mxu0 }
 0x3aa   :  { %v871_v44 = vpop.f32.mrb[34].mxu1 }
 0x3ab   :  { %v878_v45 = vrot.slane %v871_v44, 7  ;;  %v873_v16 = vpop.f32.mrb[35].mxu1  ;;  %v1098_v44 = vsel %vm1069_vm5, %v1062_v38, %v1657_v19  ;;  %v954_v38 = vand.u32 15, %v920_v2 }
 0x3ac   :  { %v879_v46 = vrot.slane %v873_v16, 7  ;;  %v1047_v16 = vcvt.s32.f32 %v1015_v40  ;;  %v1222_v40 = vld [vmem:[%s1882_s2] sm:$0x3]  ;;  %s1447_s2 = smov 2  }
 0x3ad   :  { %v1752_v47 = vsel %vm882_vm3, %v800_v43, %v878_v45  ;;  %v982_v43 = vcvt.s32.f32 %v950_v34  ;;  %v1046_v45 = vcvt.s32.f32 %v1014_v39  ;;  %v921_v34 = vadd.s32 120, %v1642_v26 }
 0x3ae   :  { %v1755_v48 = vsel %vm882_vm3, %v802_v27, %v879_v46  ;;  %v894_v49 = vsel %vm893_vm7, %v1752_v47, -inf  ;;  %v983_v27 = vcvt.s32.f32 %v951_v15  ;;  %v968_v46 = vand.u32 15, %v934_v14 }
 0x3af   :  { %v895_v50 = vsel %vm893_vm7, %v1755_v48, -inf  ;;  %v1082_v53 = vsel %vm1069_vm5, %v1046_v45, %v1657_v19  ;;  %v1083_v54 = vsel %vm1069_vm5, %v1047_v16, %v1657_v19  ;;  %v1034_v14 = vshra.s32 %v936_v0, 4 }
 0x3b0   :  { %v896_v51 = vmax.f32 %v894_v49, %v895_v50  ;;  %v1099_v49 = vsel %vm1069_vm5, %v1063_v17, %v1657_v19  ;;  %v1130_v50 = vsel %vm1068_vm4, %v998_v35, %v1098_v44  ;;  %v1000_v55 = vcvt.s32.f32 %v968_v46 }
 0x3b1   :  { %v1131_v18 = vsel %vm1068_vm4, %v999_v41, %v1099_v49  ;;  %v1114_v57 = vsel %vm1068_vm4, %v982_v43, %v1082_v53  ;;  %v1115_v58 = vsel %vm1068_vm4, %v983_v27, %v1083_v54  ;;  %v1066_v35 = vcvt.s32.f32 %v1034_v14 }
 0x3b2   :  { %897 = vmax.xlane.f32.xlu1 %v896_v51  ;;  %v969_v51 = vand.u32 15, %v935_v32  ;;  %v1388_v56 = vpack.c.bf16 %v1131_v18, %v1130_v50  ;;  %v1390_v4 = vpack.c.bf16 %v1115_v58, %v1114_v57  ;;  %v1132_v8 = vsel %vm1068_vm4, %v1000_v55, %v1100_v5 }
 0x3b3   :  { %v1085_v32 = vsel %vm1069_vm5, %v1049_v28, %v1657_v19  ;;  %v1018_v39 = vshra.s32 %v920_v2, 4  ;;  %v1067_v17 = vcvt.s32.f32 %v1035_v11  ;;  %v955_v43 = vand.u32 15, %v921_v34 }
 0x3b4   :  { %v1001_v59 = vcvt.s32.f32 %v969_v51  ;;  %1389 = vmatprep.subr.bf16.mxu0 %v1388_v56  ;;  %v1117_v15 = vsel %vm1068_vm4, %v985_v12, %v1085_v32  ;;  %v1019_v27 = vshra.s32 %v921_v34, 4  ;;  %v1102_v44 = vsel %vm1069_vm5, %v1066_v35, %v1657_v19 }
 0x3b5   :  { %1391 = vmatpush3.bf16.msra.mxu0 %v1390_v4  ;;  %v1394_v41 = vpack.c.bf16 %v1117_v15, %v1116_v33  ;;  %v986_v26 = vcvt.s32.f32 %v954_v38  ;;  %v1050_v45 = vcvt.s32.f32 %v1018_v39  ;;  %v1224_v16 = vrot.slane %v1222_v40, 6 }
 0x3b6   :  { %v1133_v24 = vsel %vm1068_vm4, %v1001_v59, %v1101_v20  ;;  %v1103_v46 = vsel %vm1069_vm5, %v1067_v17, %v1657_v19  ;;  %v1134_v49 = vsel %vm1068_vm4, %v1002_v29, %v1102_v44  ;;  %v987_v50 = vcvt.s32.f32 %v955_v43 }
 0x3b7   :  { %v1392_v30 = vpack.c.bf16 %v1133_v24, %v1132_v8  ;;  %v1051_v51 = vcvt.s32.f32 %v1019_v27  ;;  %v1135_v52 = vsel %vm1068_vm4, %v1003_v31, %v1103_v46  ;;  %v1086_v18 = vsel %vm1069_vm5, %v1050_v45, %v1657_v19  ;;  %1225 = vrot.lane.b32.xlu0 %v1224_v16, %s1447_s2 }
 0x3b8   :  { %v1396_v53 = vpack.c.bf16 %v1135_v52, %v1134_v49  ;;  %v1118_v55 = vsel %vm1068_vm4, %v986_v26, %v1086_v18 }
 0x3b9   :  { %1393 = vmatprep.subr.bf16.mxu0 %v1392_v30  ;;  %v1087_v54 = vsel %vm1069_vm5, %v1051_v51, %v1657_v19  ;;  %v1138_v19 = vrot.slane %v1596_v36, 6 }
 0x3ba   :  { %1395 = vmatpush3.bf16.msra.mxu0 %v1394_v41  ;;  %v1119_v56 = vsel %vm1068_vm4, %v987_v50, %v1087_v54 }
 0x3bb   :  { %1397 = vmatprep.subr.bf16.mxu0 %v1396_v53  ;;  %v1398_v57 = vpack.c.bf16 %v1119_v56, %v1118_v55 }
 0x3be   :  { %1399 = vmatpush3.bf16.msra.mxu0 %v1398_v57 }
 0x429   :  { %v1226_v8 = vpop.permute.xlu0 %1225 }
 0x43f   :  { %v898_v58 = vpop.xlane.xlu1 %897 }
 0x440   :  { %v899_v59 = vsub.f32 %v1752_v47, %v898_v58  ;;  %v900_v4 = vsub.f32 %v1755_v48, %v898_v58 }
 0x442   :  { %v901_v60 = vmul.f32 1.442695, %v899_v59  ;;  %v903_v61 = vmul.f32 1.442695, %v900_v4 }
 0x444   :  { %1414 = vpow2.f32 %v901_v60 }
 0x445   :  { %1416 = vpow2.f32 %v903_v61 }
 0x44e   :  { %v1415_v62 = vpop.eup %1414 }
 0x44f   :  { %v1417_v0 = vpop.eup %1416  ;;  %v1142_v1 = vsel %vm893_vm7, %v1415_v62, %v1138_v19 }
 0x450   :  { %v1143_v2 = vsel %vm893_vm7, %v1417_v0, %v1139_v63 }
 0x451   :  { %1208 = vmatprep.mubr.f32.mxu0 %v1143_v2 }
 0x452   :  { %1209 = vmatmul.mubr.f32.vlgmr.msra.gmra.mrb[20].mxu0 %v1142_v1 }
 0x525   :  { %v1317_v47 = vpop.f32.mrb[20].mxu0 }
 0x526   :  { %v1318_v48 = vpop.f32.mrb[21].mxu0 }
 0x527   :  { %v1319_v5 = vadd.f32 %v1318_v48, %v1317_v47 }
 0x529   :  { %1418 = vrcp.f32 %v1319_v5  ;;  %v1221_v6 = vmul.f32 0.00390625, %v1319_v5 }
 0x52b   :  { %v1228_v36 = vmul.f32 %v1226_v8, %v1221_v6 }
 0x533   :  { %v1419_v7 = vpop.eup %1418 }
 0x534   :  { %1217 = vperm.xlu0 %1411, %v1419_v7  }
 0x538   :  { %1231 = vperm.xlu0 %1411, %v1228_v36  }
 0x5b3   :  { %v1218_v37 = vpop.permute.xlu0 %1217 }
 0x5b4   :  { %v1220_v9 = vmul.f32 %v1319_v5, %v1218_v37 }
 0x5b6   :  { %v1235_v10 = vrot.slane %v1220_v9, 6 }
 0x5b7   :  { %v1232_v13 = vpop.permute.xlu0 %1231 }
 0x5b8   :  { %v1237_v20 = vsel %vm1070_vm6, %v1232_v13, %v1235_v10 }
 0x5b9   :  { %1238 = vst [vmem:[#allocation2 - $0x2] sm:$0xc] %v1237_v20 }
 0x5ba   :  { %1431 = shalt.err (!%p1428_p4)
}
 0x5bb   :  { %s1432_s21 = scalar_lea.hbm %s1883_s3, 32 }
 0x5bc   :  { %p1433_p5 = scmp.ne.s32.totalorder %s1883_s3, %s1432_s21  ;;  %p1436_p6 = scmp.lt.u32.totalorder %s1432_s21, %s1883_s3 }
 0x5be   :  { %p1438_p7 = pnand %p1436_p6, %p1433_p5 }
 0x5c0   :  { %1441 = shalt.err (!%p1438_p7)
}
 0x5c1   :  { %1248 = dma.vmem_to_hbm [thread:$0]  %s1246_s0, 32, %s1883_s3, [#allocation3]  }
 0x5c2   :  { %1442 = dma.done.wait [#allocation3], 32  }
 0x5c3   :  { %1443 = vsyncadd [#allocation3], 4294967264 }
 0x5c4   :  { %1252 = vsyncpa [#allocation3], 1 }

</bundles_post_ra>
